<compile_context>
chip_gen: v7x
topology: tpu7x:2x2x1
jax: 0.10.0
libtpu: 0.0.40
codegen_flags: <defaults>
</compile_context>

<pallas_src>
import functools

import jax
import jax.numpy as jnp
from jax.experimental import pallas as pl
from jax.experimental.pallas import tpu as pltpu


_LANE_PAD = 128  # zero halo on each side of the flattened spatial axis


def _round_up(x, m):
    return (x + m - 1) // m * m


def _double_conv_kernel(h, w, c1, c2, b_tile,
                        x_ref, w1_ref, b1_ref, w2_ref, b2_ref,
                        o_ref, pad_ref, patch_ref, act_ref):
    """Fused (conv3x3 + folded-BN bias + ReLU) x 2 for b_tile images.

    x_ref:     (b_tile, c1, h*w)          input images, f32
    w*_ref:    (c2, 9*c_in)               BN-scale-folded conv weights, bf16
    b*_ref:    (c2, 1)                    folded BN/conv bias, f32
    o_ref:     (b_tile, c2, h*w)          output, f32 (lane-dense last dim)
    pad_ref:   (c_max, h*w + 2*_LANE_PAD) f32 lane-padded per-image activation
    patch_ref: (9*c_max, b_tile*h*w)      bf16 im2col patch matrix (all images)
    act_ref:   (c2, b_tile*h*w)           f32 block-1 activations (all images)
    """
    hw = h * w
    c_max = max(c1, c2)

    # Zero only the halo columns; the interior is overwritten before any read.
    zeros_halo = jnp.zeros((c_max, _LANE_PAD), jnp.float32)
    pad_ref[:, 0:_LANE_PAD] = zeros_halo
    pad_ref[:, _LANE_PAD + hw:2 * _LANE_PAD + hw] = zeros_halo

    # Horizontal wrap-validity masks (f32).  Only the dw = +/-1 taps need them:
    # vertical out-of-image taps read the zeroed halo; the center tap is exact.
    col = jax.lax.broadcasted_iota(jnp.int32, (c_max, hw), 1) % w
    m_left = (col > 0).astype(jnp.float32)        # valid outputs for dw = -1
    m_right = (col < w - 1).astype(jnp.float32)   # valid outputs for dw = +1

    def conv_block(get_act, c_in, w_ref, b_ref):
        # 1) im2col: assemble (9*c_in, b_tile*hw) bf16 patches in VMEM scratch.
        for b in range(b_tile):
            pad_ref[0:c_in, _LANE_PAD:_LANE_PAD + hw] = get_act(b)
            taps = []
            for kh in range(3):
                for kw in range(3):
                    off = (kh - 1) * w + (kw - 1)
                    sh = pad_ref[0:c_in, _LANE_PAD + off:_LANE_PAD + off + hw]
                    if kw == 0:
                        sh = sh * m_left[0:c_in]
                    elif kw == 2:
                        sh = sh * m_right[0:c_in]
                    taps.append(sh.astype(jnp.bfloat16))   # per-tap bf16 cast
            patch_ref[0:9 * c_in, b * hw:(b + 1) * hw] = jnp.concatenate(
                taps, axis=0)
        # 2) One MXU dot for all b_tile images; folded bias + ReLU epilogue.
        y = jnp.dot(w_ref[...], patch_ref[0:9 * c_in, :],
                    preferred_element_type=jnp.float32)    # (c2, b_tile*hw)
        return jnp.maximum(y + b_ref[...], 0.0)

    # Block 1 (in_conv): intermediate activations stay in VMEM.
    act_ref[...] = conv_block(lambda b: x_ref[b], c1, w1_ref, b1_ref)
    # Block 2 (out_conv).
    y2 = conv_block(lambda b: act_ref[:, b * hw:(b + 1) * hw],
                    c2, w2_ref, b2_ref)
    for b in range(b_tile):
        o_ref[b] = y2[:, b * hw:(b + 1) * hw].astype(o_ref.dtype)


def double_conv(x_nchw, params1, params2, out_channels):
    """DoubleConv forward. x_nchw: (N, Cin, H, W) -> (N, out_channels, H, W)."""
    w1_mat, b1 = params1
    w2_mat, b2 = params2
    n, c_in, h, w = x_nchw.shape
    hw = h * w
    assert hw % 128 == 0, "kernel assumes H*W is a multiple of 128 lanes"
    c1 = w1_mat.shape[1] // 9     # padded input channels of block 1
    c2 = w1_mat.shape[0]          # padded output channels (== block-2 channels)

    # Channel-pad (multiple of 8 sublanes) and flatten spatial: (N, c1, H*W).
    x = jnp.pad(x_nchw.astype(jnp.float32),
                ((0, 0), (0, c1 - c_in), (0, 0), (0, 0))).reshape(n, c1, hw)

    # Image tile per grid step: large enough to amortize per-step pipeline
    # overhead, small enough to keep >= 2 grid steps (both v7x TensorCores
    # busy) and to divide N exactly (no batch-padding copy in HBM).
    target = max(1, min(8, n // 2))
    b_tile = 1
    for d in range(target, 0, -1):
        if n % d == 0:
            b_tile = d
            break
    grid = (n // b_tile,)
    c_max = max(c1, c2)

    kernel = functools.partial(_double_conv_kernel, h, w, c1, c2, b_tile)
    out = pl.pallas_call(
        kernel,
        out_shape=jax.ShapeDtypeStruct((n, c2, hw), jnp.float32),
        grid_spec=pltpu.PrefetchScalarGridSpec(
            num_scalar_prefetch=0,
            grid=grid,
            in_specs=[
                pl.BlockSpec((b_tile, c1, hw), lambda i: (i, 0, 0)),
                pl.BlockSpec((c2, 9 * c1), lambda i: (0, 0)),
                pl.BlockSpec((c2, 1), lambda i: (0, 0)),
                pl.BlockSpec((c2, 9 * c2), lambda i: (0, 0)),
                pl.BlockSpec((c2, 1), lambda i: (0, 0)),
            ],
            out_specs=pl.BlockSpec((b_tile, c2, hw), lambda i: (i, 0, 0)),
            scratch_shapes=[
                pltpu.VMEM((c_max, hw + 2 * _LANE_PAD), jnp.float32),
                pltpu.VMEM((9 * c_max, b_tile * hw), jnp.bfloat16),
                pltpu.VMEM((c2, b_tile * hw), jnp.float32),
            ],
        ),
        compiler_params=pltpu.CompilerParams(
            dimension_semantics=("parallel",)),
    )(x, w1_mat, b1, w2_mat, b2)

    out = out.reshape(n, c2, h, w)
    if out_channels != c2:
        out = out[:, :out_channels]
    return out


def _init_conv_params(key, in_ch, out_ch):
    """Deterministic Conv2d(3x3) weight/bias (PyTorch-style uniform init)."""
    kw_key, kb_key = jax.random.split(key)
    bound = 1.0 / jnp.sqrt(in_ch * 9.0)
    w = jax.random.uniform(kw_key, (out_ch, in_ch, 3, 3),
                           minval=-bound, maxval=bound, dtype=jnp.float32)
    b = jax.random.uniform(kb_key, (out_ch,),
                           minval=-bound, maxval=bound, dtype=jnp.float32)
    return w, b


def _fold_bn_and_pack(w, conv_b, c_in_pad, c_out_pad, eps=1e-5):
    """Fold eval-mode BatchNorm (fresh stats) + conv bias into the weights/bias.

    w: (c_out, c_in, 3, 3) PyTorch layout; conv_b: (c_out,)
    Returns (w_mat (c_out_pad, 9*c_in_pad) bf16 with BN scale folded in,
             bias (c_out_pad, 1) f32).
    """
    c_out, c_in = w.shape[0], w.shape[1]
    gamma = jnp.ones((c_out,), jnp.float32)
    beta = jnp.zeros((c_out,), jnp.float32)
    running_mean = jnp.zeros((c_out,), jnp.float32)
    running_var = jnp.ones((c_out,), jnp.float32)
    scale = gamma / jnp.sqrt(running_var + eps)
    bias = beta + scale * (conv_b - running_mean)

    w_p = jnp.pad(w, ((0, c_out_pad - c_out), (0, c_in_pad - c_in),
                      (0, 0), (0, 0)))
    # (Cout, Cin, kh, kw) -> (Cout, kh, kw, Cin) -> (Cout, 9*Cin): tap-major /
    # channel-minor columns, matching the in-kernel patch row layout.
    w_mat = jnp.transpose(w_p, (0, 2, 3, 1)).reshape(c_out_pad, 9 * c_in_pad)
    scale_p = jnp.pad(scale, (0, c_out_pad - c_out)).reshape(c_out_pad, 1)
    bias_p = jnp.pad(bias, (0, c_out_pad - c_out)).reshape(c_out_pad, 1)
    w_mat = (w_mat * scale_p).astype(jnp.bfloat16)   # fold BN scale into weights
    return w_mat, bias_p


def _reference_double_conv(x, w1, b1, w2, b2, eps=1e-5):
    """Pure-JAX reference of the PyTorch module (eval-mode BN, fresh stats)."""
    def block(x, w, b):
        y = jax.lax.conv_general_dilated(
            x, w, window_strides=(1, 1), padding=((1, 1), (1, 1)),
            dimension_numbers=("NCHW", "OIHW", "NCHW"))
        y = (y + b.reshape(1, -1, 1, 1)) / jnp.sqrt(1.0 + eps)
        return jnp.maximum(y, 0.0)
    return block(block(x, w1, b1), w2, b2)


if __name__ == "__main__":
    key = jax.random.PRNGKey(0)
    k_x, k_w1, k_w2 = jax.random.split(key, 3)

    N, Cin, Cout, H, W = 2, 4, 8, 16, 16
    x = jax.random.normal(k_x, (N, Cin, H, W), dtype=jnp.float32)

    w1, b1 = _init_conv_params(k_w1, Cin, Cout)    # in_conv
    w2, b2 = _init_conv_params(k_w2, Cout, Cout)   # out_conv

    c1p = _round_up(Cin, 8)
    c2p = _round_up(Cout, 8)
    params1 = _fold_bn_and_pack(w1, b1, c1p, c2p)
    params2 = _fold_bn_and_pack(w2, b2, c2p, c2p)

    fwd = jax.jit(functools.partial(double_conv, out_channels=Cout))
    out = jax.block_until_ready(fwd(x, params1, params2))

    assert out.shape == (N, Cout, H, W)
    assert bool(jnp.all(out >= 0.0))  # ReLU output

    # Numerical check against a pure-JAX f32 reference (MXU operands run in
    # bf16, so allow a loose absolute tolerance).
    ref = _reference_double_conv(x, w1, b1, w2, b2)
    max_err = float(jnp.max(jnp.abs(out - ref)))
    assert max_err < 1e-1, f"max abs error vs reference: {max_err}"

    print("KERNEL_OK")
</pallas_src>

<mosaic_0001>
module attributes {stable_mosaic.version = 11 : i64} {
  func.func @_double_conv_kernel(%arg0: i32, %arg1: memref<1x8x256xf32, #tpu.memory_space<vmem>>, %arg2: memref<8x72xbf16, #tpu.memory_space<vmem>>, %arg3: memref<8x1xf32, #tpu.memory_space<vmem>>, %arg4: memref<8x72xbf16, #tpu.memory_space<vmem>>, %arg5: memref<8x1xf32, #tpu.memory_space<vmem>>, %arg6: memref<1x8x256xf32, #tpu.memory_space<vmem>>, %arg7: memref<8x512xf32, #tpu.memory_space<vmem>>, %arg8: memref<72x256xbf16, #tpu.memory_space<vmem>>, %arg9: memref<8x256xf32, #tpu.memory_space<vmem>>) attributes {dimension_semantics = [#tpu.dimension_semantics<parallel>], iteration_bounds = array<i64: 2>, scalar_prefetch = 0 : i64, scratch_operands = 3 : i64, tpu.core_type = #tpu.core_type<tc>, window_params = [{transform_indices = @transform_0, window_bounds = array<i64: 1, 8, 256>}, {pipeline_mode = #tpu.pipeline_mode<synchronous>, transform_indices = @transform_1, window_bounds = array<i64: 8, 72>}, {pipeline_mode = #tpu.pipeline_mode<synchronous>, transform_indices = @transform_2, window_bounds = array<i64: 8, 1>}, {pipeline_mode = #tpu.pipeline_mode<synchronous>, transform_indices = @transform_3, window_bounds = array<i64: 8, 72>}, {pipeline_mode = #tpu.pipeline_mode<synchronous>, transform_indices = @transform_4, window_bounds = array<i64: 8, 1>}, {transform_indices = @transform_5, window_bounds = array<i64: 1, 8, 256>}]} {
    %cst = arith.constant 0.000000e+00 : f32
    %0 = vector.broadcast %cst : f32 to vector<8x128xf32>
    %c0 = arith.constant 0 : index
    %c0_0 = arith.constant 0 : index
    %1 = vector.load %arg7[%c0, %c0_0] : memref<8x512xf32, #tpu.memory_space<vmem>>, vector<8x128xf32>
    tpu.vector_store %arg7[%c0, %c0_0], %0 {strides = array<i32>} : memref<8x512xf32, #tpu.memory_space<vmem>>, vector<8x128xf32>,
    %c0_1 = arith.constant 0 : index
    %c384 = arith.constant 384 : index
    %2 = vector.load %arg7[%c0_1, %c384] : memref<8x512xf32, #tpu.memory_space<vmem>>, vector<8x128xf32>
    tpu.vector_store %arg7[%c0_1, %c384], %0 {strides = array<i32>} : memref<8x512xf32, #tpu.memory_space<vmem>>, vector<8x128xf32>,
    %3 = tpu.iota {dimensions = array<i32: 1>} : vector<8x256xi32>
    %c16_i32 = arith.constant 16 : i32
    %c0_i32 = arith.constant 0 : i32
    %4 = arith.cmpi eq, %c16_i32, %c0_i32 : i32
    %c1_i32 = arith.constant 1 : i32
    %5 = arith.select %4, %c1_i32, %c16_i32 : i32
    %6 = vector.broadcast %5 : i32 to vector<8x256xi32>
    %7 = arith.remsi %3, %6 : vector<8x256xi32>
    %c0_i32_2 = arith.constant 0 : i32
    %8 = vector.broadcast %c0_i32_2 : i32 to vector<8x256xi32>
    %9 = arith.cmpi ne, %7, %8 : vector<8x256xi32>
    %c0_i32_3 = arith.constant 0 : i32
    %10 = vector.broadcast %c0_i32_3 : i32 to vector<8x256xi32>
    %11 = arith.cmpi slt, %7, %10 : vector<8x256xi32>
    %c0_i32_4 = arith.constant 0 : i32
    %12 = arith.cmpi slt, %5, %c0_i32_4 : i32
    %13 = vector.broadcast %12 : i1 to vector<8x256xi1>
    %14 = vector.broadcast %13 : vector<8x256xi1> to vector<8x256xi1>
    %15 = arith.xori %11, %14 : vector<8x256xi1>
    %16 = arith.andi %15, %9 : vector<8x256xi1>
    %17 = vector.broadcast %5 : i32 to vector<8x256xi32>
    %18 = arith.addi %7, %17 : vector<8x256xi32>
    %19 = arith.select %16, %18, %7 : vector<8x256xi1>, vector<8x256xi32>
    %c0_i32_5 = arith.constant 0 : i32
    %20 = vector.broadcast %c0_i32_5 : i32 to vector<8x256xi32>
    %21 = arith.cmpi sgt, %19, %20 : vector<8x256xi32>
    %22 = arith.extui %21 : vector<8x256xi1> to vector<8x256xi32>
    %23 = arith.sitofp %22 : vector<8x256xi32> to vector<8x256xf32>
    %c15_i32 = arith.constant 15 : i32
    %24 = vector.broadcast %c15_i32 : i32 to vector<8x256xi32>
    %25 = arith.cmpi slt, %19, %24 : vector<8x256xi32>
    %26 = arith.extui %25 : vector<8x256xi1> to vector<8x256xi32>
    %27 = arith.sitofp %26 : vector<8x256xi32> to vector<8x256xf32>
    %c0_6 = arith.constant 0 : index
    %c0_7 = arith.constant 0 : index
    %c0_8 = arith.constant 0 : index
    %28 = vector.load %arg1[%c0_6, %c0_7, %c0_8] : memref<1x8x256xf32, #tpu.memory_space<vmem>>, vector<1x8x256xf32>
    %29 = vector.shape_cast %28 : vector<1x8x256xf32> to vector<8x256xf32>
    %c0_9 = arith.constant 0 : index
    %c128 = arith.constant 128 : index
    %30 = vector.load %arg7[%c0_9, %c128] : memref<8x512xf32, #tpu.memory_space<vmem>>, vector<8x256xf32>
    tpu.vector_store %arg7[%c0_9, %c128], %29 {strides = array<i32>} : memref<8x512xf32, #tpu.memory_space<vmem>>, vector<8x256xf32>,
    %c0_10 = arith.constant 0 : index
    %c111 = arith.constant 111 : index
    %31 = vector.load %arg7[%c0_10, %c111] : memref<8x512xf32, #tpu.memory_space<vmem>>, vector<8x256xf32>
    %32 = arith.mulf %31, %23 : vector<8x256xf32>
    %33 = arith.truncf %32 : vector<8x256xf32> to vector<8x256xbf16>
    %c0_11 = arith.constant 0 : index
    %c112 = arith.constant 112 : index
    %34 = vector.load %arg7[%c0_11, %c112] : memref<8x512xf32, #tpu.memory_space<vmem>>, vector<8x256xf32>
    %35 = arith.truncf %34 : vector<8x256xf32> to vector<8x256xbf16>
    %c0_12 = arith.constant 0 : index
    %c113 = arith.constant 113 : index
    %36 = vector.load %arg7[%c0_12, %c113] : memref<8x512xf32, #tpu.memory_space<vmem>>, vector<8x256xf32>
    %37 = arith.mulf %36, %27 : vector<8x256xf32>
    %38 = arith.truncf %37 : vector<8x256xf32> to vector<8x256xbf16>
    %c0_13 = arith.constant 0 : index
    %c127 = arith.constant 127 : index
    %39 = vector.load %arg7[%c0_13, %c127] : memref<8x512xf32, #tpu.memory_space<vmem>>, vector<8x256xf32>
    %40 = arith.mulf %39, %23 : vector<8x256xf32>
    %41 = arith.truncf %40 : vector<8x256xf32> to vector<8x256xbf16>
    %c0_14 = arith.constant 0 : index
    %c128_15 = arith.constant 128 : index
    %42 = vector.load %arg7[%c0_14, %c128_15] : memref<8x512xf32, #tpu.memory_space<vmem>>, vector<8x256xf32>
    %43 = arith.truncf %42 : vector<8x256xf32> to vector<8x256xbf16>
    %c0_16 = arith.constant 0 : index
    %c129 = arith.constant 129 : index
    %44 = vector.load %arg7[%c0_16, %c129] : memref<8x512xf32, #tpu.memory_space<vmem>>, vector<8x256xf32>
    %45 = arith.mulf %44, %27 : vector<8x256xf32>
    %46 = arith.truncf %45 : vector<8x256xf32> to vector<8x256xbf16>
    %c0_17 = arith.constant 0 : index
    %c143 = arith.constant 143 : index
    %47 = vector.load %arg7[%c0_17, %c143] : memref<8x512xf32, #tpu.memory_space<vmem>>, vector<8x256xf32>
    %48 = arith.mulf %47, %23 : vector<8x256xf32>
    %49 = arith.truncf %48 : vector<8x256xf32> to vector<8x256xbf16>
    %c0_18 = arith.constant 0 : index
    %c144 = arith.constant 144 : index
    %50 = vector.load %arg7[%c0_18, %c144] : memref<8x512xf32, #tpu.memory_space<vmem>>, vector<8x256xf32>
    %51 = arith.truncf %50 : vector<8x256xf32> to vector<8x256xbf16>
    %c0_19 = arith.constant 0 : index
    %c145 = arith.constant 145 : index
    %52 = vector.load %arg7[%c0_19, %c145] : memref<8x512xf32, #tpu.memory_space<vmem>>, vector<8x256xf32>
    %53 = arith.mulf %52, %27 : vector<8x256xf32>
    %54 = arith.truncf %53 : vector<8x256xf32> to vector<8x256xbf16>
    %55 = tpu.concatenate %33, %35, %38, %41, %43, %46, %49, %51, %54 in 0 : vector<8x256xbf16>, vector<8x256xbf16>, vector<8x256xbf16>, vector<8x256xbf16>, vector<8x256xbf16>, vector<8x256xbf16>, vector<8x256xbf16>, vector<8x256xbf16>, vector<8x256xbf16> -> vector<72x256xbf16>
    %c0_20 = arith.constant 0 : index
    %c0_21 = arith.constant 0 : index
    %56 = vector.load %arg8[%c0_20, %c0_21] : memref<72x256xbf16, #tpu.memory_space<vmem>>, vector<72x256xbf16>
    tpu.vector_store %arg8[%c0_20, %c0_21], %55 {strides = array<i32>} : memref<72x256xbf16, #tpu.memory_space<vmem>>, vector<72x256xbf16>,
    %c0_22 = arith.constant 0 : index
    %c0_23 = arith.constant 0 : index
    %57 = vector.load %arg2[%c0_22, %c0_23] : memref<8x72xbf16, #tpu.memory_space<vmem>>, vector<8x72xbf16>
    %c0_24 = arith.constant 0 : index
    %c0_25 = arith.constant 0 : index
    %58 = vector.load %arg8[%c0_24, %c0_25] : memref<72x256xbf16, #tpu.memory_space<vmem>>, vector<72x256xbf16>
    %cst_26 = arith.constant dense<0.000000e+00> : vector<8x256xf32>
    %59 = tpu.matmul %57, %58, %cst_26 {dimension_numbers = #tpu.dot_dimension_numbers<[1], [0], [0], [1], [0, 0, 1, 1], [], []>} : vector<8x72xbf16>, vector<72x256xbf16>, vector<8x256xf32> -> vector<8x256xf32>
    %c0_27 = arith.constant 0 : index
    %c0_28 = arith.constant 0 : index
    %60 = vector.load %arg3[%c0_27, %c0_28] : memref<8x1xf32, #tpu.memory_space<vmem>>, vector<8x1xf32>
    %61 = vector.broadcast %60 : vector<8x1xf32> to vector<8x256xf32>
    %62 = arith.addf %59, %61 : vector<8x256xf32>
    %cst_29 = arith.constant 0.000000e+00 : f32
    %63 = vector.broadcast %cst_29 : f32 to vector<8x256xf32>
    %64 = arith.maximumf %62, %63 : vector<8x256xf32>
    %c0_30 = arith.constant 0 : index
    %c0_31 = arith.constant 0 : index
    %65 = vector.load %arg9[%c0_30, %c0_31] : memref<8x256xf32, #tpu.memory_space<vmem>>, vector<8x256xf32>
    tpu.vector_store %arg9[%c0_30, %c0_31], %64 {strides = array<i32>} : memref<8x256xf32, #tpu.memory_space<vmem>>, vector<8x256xf32>,
    %c0_32 = arith.constant 0 : index
    %c0_33 = arith.constant 0 : index
    %66 = vector.load %arg9[%c0_32, %c0_33] : memref<8x256xf32, #tpu.memory_space<vmem>>, vector<8x256xf32>
    %c0_34 = arith.constant 0 : index
    %c128_35 = arith.constant 128 : index
    %67 = vector.load %arg7[%c0_34, %c128_35] : memref<8x512xf32, #tpu.memory_space<vmem>>, vector<8x256xf32>
    tpu.vector_store %arg7[%c0_34, %c128_35], %66 {strides = array<i32>} : memref<8x512xf32, #tpu.memory_space<vmem>>, vector<8x256xf32>,
    %c0_36 = arith.constant 0 : index
    %c111_37 = arith.constant 111 : index
    %68 = vector.load %arg7[%c0_36, %c111_37] : memref<8x512xf32, #tpu.memory_space<vmem>>, vector<8x256xf32>
    %69 = arith.mulf %68, %23 : vector<8x256xf32>
    %70 = arith.truncf %69 : vector<8x256xf32> to vector<8x256xbf16>
    %c0_38 = arith.constant 0 : index
    %c112_39 = arith.constant 112 : index
    %71 = vector.load %arg7[%c0_38, %c112_39] : memref<8x512xf32, #tpu.memory_space<vmem>>, vector<8x256xf32>
    %72 = arith.truncf %71 : vector<8x256xf32> to vector<8x256xbf16>
    %c0_40 = arith.constant 0 : index
    %c113_41 = arith.constant 113 : index
    %73 = vector.load %arg7[%c0_40, %c113_41] : memref<8x512xf32, #tpu.memory_space<vmem>>, vector<8x256xf32>
    %74 = arith.mulf %73, %27 : vector<8x256xf32>
    %75 = arith.truncf %74 : vector<8x256xf32> to vector<8x256xbf16>
    %c0_42 = arith.constant 0 : index
    %c127_43 = arith.constant 127 : index
    %76 = vector.load %arg7[%c0_42, %c127_43] : memref<8x512xf32, #tpu.memory_space<vmem>>, vector<8x256xf32>
    %77 = arith.mulf %76, %23 : vector<8x256xf32>
    %78 = arith.truncf %77 : vector<8x256xf32> to vector<8x256xbf16>
    %c0_44 = arith.constant 0 : index
    %c128_45 = arith.constant 128 : index
    %79 = vector.load %arg7[%c0_44, %c128_45] : memref<8x512xf32, #tpu.memory_space<vmem>>, vector<8x256xf32>
    %80 = arith.truncf %79 : vector<8x256xf32> to vector<8x256xbf16>
    %c0_46 = arith.constant 0 : index
    %c129_47 = arith.constant 129 : index
    %81 = vector.load %arg7[%c0_46, %c129_47] : memref<8x512xf32, #tpu.memory_space<vmem>>, vector<8x256xf32>
    %82 = arith.mulf %81, %27 : vector<8x256xf32>
    %83 = arith.truncf %82 : vector<8x256xf32> to vector<8x256xbf16>
    %c0_48 = arith.constant 0 : index
    %c143_49 = arith.constant 143 : index
    %84 = vector.load %arg7[%c0_48, %c143_49] : memref<8x512xf32, #tpu.memory_space<vmem>>, vector<8x256xf32>
    %85 = arith.mulf %84, %23 : vector<8x256xf32>
    %86 = arith.truncf %85 : vector<8x256xf32> to vector<8x256xbf16>
    %c0_50 = arith.constant 0 : index
    %c144_51 = arith.constant 144 : index
    %87 = vector.load %arg7[%c0_50, %c144_51] : memref<8x512xf32, #tpu.memory_space<vmem>>, vector<8x256xf32>
    %88 = arith.truncf %87 : vector<8x256xf32> to vector<8x256xbf16>
    %c0_52 = arith.constant 0 : index
    %c145_53 = arith.constant 145 : index
    %89 = vector.load %arg7[%c0_52, %c145_53] : memref<8x512xf32, #tpu.memory_space<vmem>>, vector<8x256xf32>
    %90 = arith.mulf %89, %27 : vector<8x256xf32>
    %91 = arith.truncf %90 : vector<8x256xf32> to vector<8x256xbf16>
    %92 = tpu.concatenate %70, %72, %75, %78, %80, %83, %86, %88, %91 in 0 : vector<8x256xbf16>, vector<8x256xbf16>, vector<8x256xbf16>, vector<8x256xbf16>, vector<8x256xbf16>, vector<8x256xbf16>, vector<8x256xbf16>, vector<8x256xbf16>, vector<8x256xbf16> -> vector<72x256xbf16>
    %c0_54 = arith.constant 0 : index
    %c0_55 = arith.constant 0 : index
    %93 = vector.load %arg8[%c0_54, %c0_55] : memref<72x256xbf16, #tpu.memory_space<vmem>>, vector<72x256xbf16>
    tpu.vector_store %arg8[%c0_54, %c0_55], %92 {strides = array<i32>} : memref<72x256xbf16, #tpu.memory_space<vmem>>, vector<72x256xbf16>,
    %c0_56 = arith.constant 0 : index
    %c0_57 = arith.constant 0 : index
    %94 = vector.load %arg4[%c0_56, %c0_57] : memref<8x72xbf16, #tpu.memory_space<vmem>>, vector<8x72xbf16>
    %c0_58 = arith.constant 0 : index
    %c0_59 = arith.constant 0 : index
    %95 = vector.load %arg8[%c0_58, %c0_59] : memref<72x256xbf16, #tpu.memory_space<vmem>>, vector<72x256xbf16>
    %cst_60 = arith.constant dense<0.000000e+00> : vector<8x256xf32>
    %96 = tpu.matmul %94, %95, %cst_60 {dimension_numbers = #tpu.dot_dimension_numbers<[1], [0], [0], [1], [0, 0, 1, 1], [], []>} : vector<8x72xbf16>, vector<72x256xbf16>, vector<8x256xf32> -> vector<8x256xf32>
    %c0_61 = arith.constant 0 : index
    %c0_62 = arith.constant 0 : index
    %97 = vector.load %arg5[%c0_61, %c0_62] : memref<8x1xf32, #tpu.memory_space<vmem>>, vector<8x1xf32>
    %98 = vector.broadcast %97 : vector<8x1xf32> to vector<8x256xf32>
    %99 = arith.addf %96, %98 : vector<8x256xf32>
    %cst_63 = arith.constant 0.000000e+00 : f32
    %100 = vector.broadcast %cst_63 : f32 to vector<8x256xf32>
    %101 = arith.maximumf %99, %100 : vector<8x256xf32>
    %c0_64 = arith.constant 0 : index
    %c0_65 = arith.constant 0 : index
    %c0_66 = arith.constant 0 : index
    %102 = vector.load %arg6[%c0_64, %c0_65, %c0_66] : memref<1x8x256xf32, #tpu.memory_space<vmem>>, vector<1x8x256xf32>
    %103 = vector.shape_cast %102 : vector<1x8x256xf32> to vector<8x256xf32>
    %104 = vector.shape_cast %101 : vector<8x256xf32> to vector<1x8x256xf32>
    tpu.vector_store %arg6[%c0_64, %c0_65, %c0_66], %104 {strides = array<i32>} : memref<1x8x256xf32, #tpu.memory_space<vmem>>, vector<1x8x256xf32>,
    return
  }
  func.func @transform_0(%arg0: i32) -> (i32, i32, i32) {
    %c0_i32 = arith.constant 0 : i32
    %c0_i32_0 = arith.constant 0 : i32
    %c0_i32_1 = arith.constant 0 : i32
    return %arg0, %c0_i32, %c0_i32_0 : i32, i32, i32
  }
  func.func @transform_1(%arg0: i32) -> (i32, i32) {
    %c0_i32 = arith.constant 0 : i32
    %c0_i32_0 = arith.constant 0 : i32
    %c0_i32_1 = arith.constant 0 : i32
    return %c0_i32, %c0_i32_0 : i32, i32
  }
  func.func @transform_2(%arg0: i32) -> (i32, i32) {
    %c0_i32 = arith.constant 0 : i32
    %c0_i32_0 = arith.constant 0 : i32
    %c0_i32_1 = arith.constant 0 : i32
    return %c0_i32, %c0_i32_0 : i32, i32
  }
  func.func @transform_3(%arg0: i32) -> (i32, i32) {
    %c0_i32 = arith.constant 0 : i32
    %c0_i32_0 = arith.constant 0 : i32
    %c0_i32_1 = arith.constant 0 : i32
    return %c0_i32, %c0_i32_0 : i32, i32
  }
  func.func @transform_4(%arg0: i32) -> (i32, i32) {
    %c0_i32 = arith.constant 0 : i32
    %c0_i32_0 = arith.constant 0 : i32
    %c0_i32_1 = arith.constant 0 : i32
    return %c0_i32, %c0_i32_0 : i32, i32
  }
  func.func @transform_5(%arg0: i32) -> (i32, i32, i32) {
    %c0_i32 = arith.constant 0 : i32
    %c0_i32_0 = arith.constant 0 : i32
    %c0_i32_1 = arith.constant 0 : i32
    return %arg0, %c0_i32, %c0_i32_0 : i32, i32, i32
  }
}

</mosaic_0001>

<bundles_post_ra>
// kernel: double_conv.1
= control target key start
LH: loop header
LB: loop body
LE: loop exit
PB: predicated region body
PF: predicated region fallthrough
CT: control target
= control target key end

     0   :  { %s1465_s18 = smov 0   ;;  %s1805_s0 = inlined_call_operand.vmem [shape: f32[2,8,256], index: 0, kind: input, shape index: {}]   ;;  %s1806_s1 = inlined_call_operand.vmem [shape: bf16[8,72], index: 1, kind: input, shape index: {}]   ;;  %s1807_s2 = inlined_call_operand.vmem [shape: f32[8,1], index: 2, kind: input, shape index: {}]   ;;  %s1808_s3 = inlined_call_operand.vmem [shape: bf16[8,72], index: 3, kind: input, shape index: {}]   ;;  %s1809_s4 = inlined_call_operand.vmem [shape: f32[8,1], index: 4, kind: input, shape index: {}]   ;;  %s1810_s5 = inlined_call_operand.vmem [shape: f32[2,8,256], index: 5, kind: output, shape index: {}]  }
   0x1 LB: > { %s1280_s19 = sadd.s32 4294967295, %s1418_s18   ;;  %p1284_p0 = scmp.ge.s32.totalorder %s1418_s18, 1  ;;  %s1418_s18 = sphi %s1465_s18, %s15_s18  }
   0x2   : > { %p187_p1 = scmp.lt.s32.totalorder %s1418_s18, 3 }
   0x4   : > { %p188_p2 = pnand %p1284_p0, %p187_p1 }
   0x5   : > { %v228_v0 = vlaneseq (!%p188_p2)  ;;  %p215_p3 = scmp.lt.s32.totalorder (!%p188_p2), %s1280_s19, 1  ;;  %v1420_v5 = vmov (!%p188_p2), 0.0   ;;  %s1421_s24 = smov (!%p188_p2), 1   ;;  %v1427_v15 = vmov (!%p188_p2), 0.0|0.0   ;;  %vm300_vm4 = vcmask (!%p188_p2), 924672  }
   0x6   : > { %191 = sbr.rel (%p188_p2) target bundleno = 1166 (0x48e), region = 40  ;;  %s1422_s25 = smov (!%p188_p2), 127   ;;  %v1492_v16 = vrot.slane (!%p188_p2), %v1427_v15, 4  ;;  %vm348_vm5 = vcmask (!%p188_p2), 121856   ;;  %vm333_vm6 = vcmask (!%p188_p2), 7168   ;;  %vm315_vm7 = vcmask (!%p188_p2), 1039360  }
   0x7   : > { %v229_v1 = vand.u32 (!%p188_p2), 127, %v228_v0  ;;  %s1423_s26 = smov (!%p188_p2), 15   ;;  %s1424_s27 = smov (!%p188_p2), 113   ;;  %vm280_vm8 = vcmask (!%p188_p2), 908288   ;;  %vm366_vm9 = vcmask (!%p188_p2), 138240   ;;  %vm479_vm10 = vcmask (!%p188_p2), 1043456  }
   0x8   : > { %s1425_s28 = smov (!%p188_p2), 17   ;;  %s1426_s29 = smov (!%p188_p2), 111   ;;  %vm449_vm11 = vcmask (!%p188_p2), 785408   ;;  %vm416_vm12 = vcmask (!%p188_p2), 916480   ;;  %vm464_vm13 = vcmask (!%p188_p2), 777216   ;;  %vm401_vm14 = vcmask (!%p188_p2), 1031168  }
   0x9   : > { %v230_v2 = vadd.s32 (!%p188_p2), 128, %v229_v1  ;;  %v235_v3 = vand.u32 (!%p188_p2), 15, %v229_v1  ;;  %s1428_s30 = smov (!%p188_p2), 96   ;;  %s1429_s6 = smov (!%p188_p2), 126   ;;  %vm437_vm15 = vcmask (!%p188_p2), 900096  }
   0xa   : > { %s1430_s7 = smov (!%p188_p2), 112   ;;  %s1431_s8 = smov (!%p188_p2), 110  }
   0xb   : > { %v242_v4 = vand.u32 (!%p188_p2), 15, %v230_v2  ;;  %vm261_vm0 = vcmp.lt.s32.totalorder (!%p188_p2), %v235_v3, 15  ;;  %vm255_vm1 = vcmp.gt.s32.totalorder (!%p188_p2), %v235_v3, 0  ;;  %s1432_s9 = smov (!%p188_p2), 95   ;;  %s1433_s10 = smov (!%p188_p2), 94  }
   0xc   : > { %v1291_v6 = vsel (!%p188_p2), %vm261_vm0, 1.0, %v1420_v5  ;;  %v1289_v7 = vsel (!%p188_p2), %vm255_vm1, 1.0, %v1420_v5  ;;  %vm476_vm0 = vcmask (!%p188_p2), 769024   ;;  %vm726_vm1 = vcmask (!%p188_p2), 588800  }
   0xd   : > { %s1812_s19 = smov (!%p215_p3, %s1280_s19), 1  ;;  %vm262_vm2 = vcmp.lt.s32.totalorder %v242_v4, 15  ;;  %vm256_vm3 = vcmp.gt.s32.totalorder %v242_v4, 0 }
   0xe   : > { %s1355_s20 = sshll.u32 %s1812_s19, 4  ;;  %v1292_v8 = vsel %vm262_vm2, 1.0, %v1420_v5  ;;  %v1290_v9 = vsel %vm256_vm3, 1.0, %v1420_v5 }
   0xf   : > { %v1390_v10 = vpack.i.bf16 %v1292_v8, %v1291_v6  ;;  %v1380_v11 = vpack.i.bf16 %v1290_v9, %v1289_v7  ;;  %s219_s23 = scalar_lea.vmem %s1805_s0, %s1355_s20 }
  0x10   : > { %v1482_v12 = vld [vmem:[%s219_s23] sm:$0xff]  ;;  %v1488_v14 = vld [vmem:[%s219_s23 + $0x8] sm:$0xff] }
  0x11   : > { %1391 = vrot.lane.b32.xlu1 %v1390_v10, %s1421_s24  ;;  %1381 = vrot.lane.b32.xlu0 %v1380_v11, %s1422_s25  ;;  %v1486_v13 = vpack.c.bf16 %v1482_v12, %v1482_v12  ;;  %v1496_v17 = vpack.c.bf16 %v1488_v14, %v1488_v14  ;;  %s224_s24 = scalar_lea.vmem %s1810_s5, %s1355_s20 }
  0x13   : > { %v381_v18 = vrot.slane %v1486_v13, 4  ;;  %v382_v19 = vrot.slane %v1496_v17, 4 }
  0x15   : > { %1396 = vrot.lane.b32.xlu1 %v1380_v11, %s1423_s26  ;;  %1386 = vrot.lane.b32.xlu0 %v1390_v10, %s1424_s27 }
  0x19   : > { %1401 = vrot.lane.b32.xlu0 %v1390_v10, %s1425_s28  ;;  %1406 = vrot.lane.b32.xlu1 %v1380_v11, %s1426_s29 }
  0x1d   : > { %383 = vrot.lane.b32.xlu0 %v1492_v16, %s1422_s25  ;;  %385 = vrot.lane.b32.xlu1 %v381_v18, %s1422_s25 }
  0x21   : > { %387 = vrot.lane.b32.xlu0 %v382_v19, %s1422_s25  ;;  %419 = vrot.lane.b32.xlu1 %v1486_v13, %s1426_s29 }
  0x25   : > { %421 = vrot.lane.b32.xlu0 %v1496_v17, %s1426_s29 }
  0x83   : > { %v1392_v20 = vpop.permute.xlu1 %1391  ;;  %v1382_v21 = vpop.permute.xlu0 %1381 }
  0x84   : > { %v1383_v22 = vunpack.i.l.bf16 %v1382_v21  ;;  %v1514_v27 = vunpack.i.l.bf16 %v1392_v20  ;;  %v1529_v38 = vunpack.i.h.bf16 %v1382_v21  ;;  %v1394_v41 = vunpack.i.h.bf16 %v1392_v20 }
  0x86   : > { %v320_v25 = vmul.f32 0.0, %v1383_v22  ;;  %v338_v37 = vmul.f32 %v1514_v27, %v1482_v12  ;;  %v322_v48 = vmul.f32 %v1529_v38, %v1488_v14  ;;  %v340_v49 = vmul.f32 0.0, %v1394_v41 }
  0x87   : > { %v1397_v23 = vpop.permute.xlu1 %1396  ;;  %v1387_v24 = vpop.permute.xlu0 %1386  ;;  %v1551_v52 = vsel %vm333_vm6, %v1514_v27, %v1394_v41  ;;  %v1557_v53 = vsel %vm315_vm7, %v1383_v22, %v1529_v38  ;;  %v1434_v41 = vmov 0  }
  0x88   : > { %v1512_v26 = vunpack.i.l.bf16 %v1397_v23  ;;  %v1516_v28 = vunpack.i.h.bf16 %v1387_v24  ;;  %v1388_v29 = vunpack.i.l.bf16 %v1387_v24  ;;  %v323_v32 = vpack.c.bf16 %v320_v25, %v320_v25  ;;  %768 = vmatprep.mubr.bf16.mxu0 %v1434_v41  ;;  %1410 = vset.pattern.permute.xlu1 %v1434_v41 }
  0x89   : > { %v1399_v33 = vunpack.i.h.bf16 %v1397_v23  ;;  %v341_v43 = vpack.c.bf16 %v338_v37, %v338_v37  ;;  %v325_v55 = vpack.c.bf16 %v322_v48, %v322_v48  ;;  %v339_v56 = vmul.f32 %v1551_v52, %v1488_v14  ;;  %1212 = vmatprep.mubr.bf16.mxu1 %v1434_v41  ;;  %1411 = vset.pattern.permute.xlu0 %v1434_v41 }
  0x8a   : > { %v353_v30 = vmul.f32 %v1512_v26, %v1482_v12  ;;  %v305_v31 = vmul.f32 0.0, %v1388_v29  ;;  %v307_v36 = vmul.f32 %v1516_v28, %v1488_v14  ;;  %v1531_v40 = vrot.slane %v323_v32, 4 }
  0x8b   : > { %v355_v39 = vmul.f32 0.0, %v1399_v33  ;;  %v1534_v44 = vsel %vm300_vm4, %v1388_v29, %v1516_v28  ;;  %v1539_v45 = vsel %vm348_vm5, %v1512_v26, %v1399_v33  ;;  %v428_v50 = vrot.slane %v341_v43, 4  ;;  %v1407_v60 = vpop.permute.xlu1 %1406  ;;  %v1402_v61 = vpop.permute.xlu0 %1401 }
  0x8c   : > { %v356_v34 = vpack.c.bf16 %v353_v30, %v353_v30  ;;  %v1520_v35 = vpack.c.bf16 %v305_v31, %v305_v31  ;;  %v310_v42 = vpack.c.bf16 %v307_v36, %v307_v36  ;;  %v306_v47 = vmul.f32 %v1534_v44, %v1482_v12 }
  0x8d   : > { %v1542_v46 = vpack.c.bf16 %v355_v39, %v355_v39  ;;  %v354_v51 = vmul.f32 %v1539_v45, %v1488_v14  ;;  %v343_v57 = vpack.c.bf16 %v340_v49, %v340_v49  ;;  %v321_v59 = vmul.f32 %v1557_v53, %v1482_v12 }
  0x8e   : > { %443 = vrot.lane.b32.xlu0 %v356_v34, %s1428_s30  ;;  %395 = vrot.lane.b32.xlu1 %v1520_v35, %s1429_s6  ;;  %v309_v54 = vpack.c.bf16 %v306_v47, %v306_v47  ;;  %v409_v62 = vrot.slane %v325_v55, 4  ;;  %v342_v63 = vpack.c.bf16 %v339_v56, %v339_v56  ;;  %v1568_v2 = vunpack.i.h.bf16 %v1407_v60 }
  0x8f   : > { %v357_v58 = vpack.c.bf16 %v354_v51, %v354_v51  ;;  %v1566_v0 = vrot.slane %v343_v57, 4  ;;  %v324_v1 = vpack.c.bf16 %v321_v59, %v321_v59  ;;  %v1408_v3 = vunpack.i.l.bf16 %v1407_v60  ;;  %v384_v7 = vpop.permute.xlu0 %383  ;;  %v386_v25 = vpop.permute.xlu1 %385 }
  0x90   : > { %v1571_v4 = vunpack.i.l.bf16 %v1402_v61  ;;  %v429_v5 = vrot.slane %v342_v63, 4  ;;  %v1404_v6 = vunpack.i.h.bf16 %v1402_v61  ;;  %v287_v11 = vmul.f32 %v1568_v2, %v1488_v14 }
  0x91   : > { %v408_v8 = vrot.slane %v324_v1, 4  ;;  %v1577_v9 = vsel %vm280_vm8, %v1408_v3, %v1568_v2  ;;  %v285_v20 = vmul.f32 0.0, %v1408_v3  ;;  %v390_v32 = vsel %vm315_vm7, %v384_v7, %v386_v25 }
  0x92   : > { %410 = vrot.lane.b32.xlu0 %v1531_v40, %s1430_s7  ;;  %399 = vrot.lane.b32.xlu1 %v310_v42, %s1429_s6  ;;  %v371_v10 = vmul.f32 %v1571_v4, %v1482_v12  ;;  %v1587_v15 = vsel %vm366_vm9, %v1571_v4, %v1404_v6  ;;  %v286_v21 = vmul.f32 %v1577_v9, %v1482_v12  ;;  %v373_v22 = vmul.f32 0.0, %v1404_v6 }
  0x93   : > { %v388_v24 = vpop.permute.xlu0 %387  ;;  %v372_v29 = vmul.f32 %v1587_v15, %v1488_v14  ;;  %v290_v30 = vpack.c.bf16 %v287_v11, %v287_v11  ;;  %v1599_v31 = vpack.c.bf16 %v285_v20, %v285_v20  ;;  %v420_v43 = vpop.permute.xlu1 %419 }
  0x94   : > { %v374_v23 = vpack.c.bf16 %v371_v10, %v371_v10  ;;  %v289_v12 = vpack.c.bf16 %v286_v21, %v286_v21  ;;  %v391_v17 = vsel %vm315_vm7, %v386_v25, %v388_v24 }
  0x95   : > { %v375_v13 = vpack.c.bf16 %v372_v29, %v372_v29  ;;  %v488_v14 = vsel %vm479_vm10, %v290_v30, %v388_v24 }
  0x96   : > { %447 = vrot.lane.b32.xlu0 %v1542_v46, %s1428_s30  ;;  %431 = vrot.lane.b32.xlu1 %v428_v50, %s1431_s8  ;;  %v485_v33 = vsel %vm479_vm10, %v289_v12, %v391_v17  ;;  %v1294_v34 = vcombine.low %v488_v14, %v488_v14  ;;  %v1296_v37 = vcombine.high %v488_v14, %v488_v14 }
  0x97   : > { %v422_v42 = vpop.permute.xlu0 %421 }
  0x9a   : > { %397 = vrot.lane.b32.xlu0 %v309_v54, %s1429_s6  ;;  %445 = vrot.lane.b32.xlu1 %v357_v58, %s1428_s30 }
  0x9e   : > { %414 = vrot.lane.b32.xlu0 %v409_v62, %s1430_s7  ;;  %435 = vrot.lane.b32.xlu1 %v1566_v0, %s1431_s8 }
  0xa2   : > { %433 = vrot.lane.b32.xlu0 %v429_v5, %s1431_s8  ;;  %412 = vrot.lane.b32.xlu1 %v408_v8, %s1430_s7 }
  0xa6   : > { %460 = vrot.lane.b32.xlu0 %v382_v19, %s1432_s9  ;;  %458 = vrot.lane.b32.xlu1 %v381_v18, %s1432_s9  ;;  %v1604_v19 = vpack.c.bf16 %v373_v22, %v373_v22  ;;  %v482_v18 = vsel %vm479_vm10, %v1599_v31, %v390_v32 }
  0xa7   : > { %v1293_v36 = vcombine.low %v482_v18, %v485_v33  ;;  %v1295_v39 = vcombine.high %v482_v18, %v485_v33 }
  0xaa   : > { %470 = vrot.lane.b32.xlu0 %v374_v23, %s1433_s10  ;;  %462 = vrot.lane.b32.xlu1 %v1492_v16, %s1432_s9 }
  0xae   : > { %474 = vrot.lane.b32.xlu0 %v1604_v19, %s1433_s10  ;;  %472 = vrot.lane.b32.xlu1 %v375_v13, %s1433_s10 }
  0xb2   : > { %575 = vrot.lane.b32.xlu0 %v1294_v34, %s1425_s28  ;;  %573 = vrot.lane.b32.xlu1 %v1293_v36, %s1425_s28 }
  0xb6   : > { %579 = vrot.lane.b32.xlu0 %v1296_v37, %s1425_s28  ;;  %577 = vrot.lane.b32.xlu1 %v1295_v39, %s1425_s28  ;;  %v424_v37 = vsel %vm280_vm8, %v420_v43, %v422_v42 }
 0x100   : > { %v444_v47 = vpop.permute.xlu0 %443  ;;  %v396_v48 = vpop.permute.xlu1 %395 }
 0x104   : > { %v411_v49 = vpop.permute.xlu0 %410  ;;  %v400_v50 = vpop.permute.xlu1 %399 }
 0x108   : > { %v448_v51 = vpop.permute.xlu0 %447  ;;  %v432_v54 = vpop.permute.xlu1 %431 }
 0x10c   : > { %v398_v55 = vpop.permute.xlu0 %397  ;;  %v446_v56 = vpop.permute.xlu1 %445 }
 0x10d   : > { %v450_v3 = vsel %vm449_vm11, %v444_v47, %v446_v56  ;;  %v402_v20 = vsel %vm401_vm14, %v396_v48, %v398_v55  ;;  %v403_v21 = vsel %vm401_vm14, %v398_v55, %v400_v50  ;;  %v451_v30 = vsel %vm449_vm11, %v446_v56, %v448_v51 }
 0x10e   : > { %v500_v55 = vsel %vm479_vm10, %v420_v43, %v432_v54 }
 0x110   : > { %v415_v57 = vpop.permute.xlu0 %414  ;;  %v436_v59 = vpop.permute.xlu1 %435 }
 0x111   : > { %v497_v58 = vsel %vm479_vm10, %v400_v50, %v415_v57 }
 0x112   : > { %v1298_v60 = vcombine.low %v497_v58, %v497_v58  ;;  %v1300_v63 = vcombine.high %v497_v58, %v497_v58 }
 0x114   : > { %v434_v61 = vpop.permute.xlu0 %433  ;;  %583 = vrot.lane.b32.xlu0 %v1298_v60, %s1425_s28  ;;  %v413_v62 = vpop.permute.xlu1 %412 }
 0x115   : > { %v417_v6 = vsel %vm416_vm12, %v411_v49, %v413_v62  ;;  %v418_v7 = vsel %vm416_vm12, %v413_v62, %v415_v57  ;;  %v439_v12 = vsel %vm437_vm15, %v434_v61, %v436_v59  ;;  %v438_v36 = vsel %vm437_vm15, %v432_v54, %v434_v61 }
 0x116   : > { %v491_v24 = vsel %vm479_vm10, %v402_v20, %v417_v6  ;;  %v494_v25 = vsel %vm479_vm10, %v403_v21, %v418_v7  ;;  %v506_v33 = vsel %vm479_vm10, %v422_v42, %v439_v12  ;;  %v503_v48 = vsel %vm479_vm10, %v424_v37, %v438_v36 }
 0x117   : > { %v1297_v14 = vcombine.low %v491_v24, %v494_v25  ;;  %v1302_v39 = vcombine.low %v506_v33, %v506_v33  ;;  %v1299_v41 = vcombine.high %v491_v24, %v494_v25  ;;  %v1304_v56 = vcombine.high %v506_v33, %v506_v33 }
 0x118   : > { %v461_v1 = vpop.permute.xlu0 %460  ;;  %587 = vrot.lane.b32.xlu0 %v1300_v63, %s1425_s28  ;;  %v459_v5 = vpop.permute.xlu1 %458  ;;  %v1301_v57 = vcombine.low %v500_v55, %v503_v48 }
 0x119   : > { %v465_v8 = vsel %vm464_vm13, %v459_v5, %v461_v1  ;;  %v509_v10 = vsel %vm479_vm10, %v444_v47, %v459_v5 }
 0x11a   : > { %v512_v11 = vsel %vm479_vm10, %v450_v3, %v465_v8  ;;  %v1303_v3 = vcombine.high %v500_v55, %v503_v48 }
 0x11b   : > { %v1305_v22 = vcombine.low %v509_v10, %v512_v11  ;;  %v1307_v8 = vcombine.high %v509_v10, %v512_v11 }
 0x11c   : > { %v471_v23 = vpop.permute.xlu0 %470  ;;  %v463_v29 = vpop.permute.xlu1 %462 }
 0x11d   : > { %v466_v32 = vsel %vm464_vm13, %v461_v1, %v463_v29  ;;  %597 = vrot.lane.b32.xlu1 %v1305_v22, %s1425_s28  ;;  %v675_v22 = vld [vmem:[%s1807_s2] sm:$0xff] }
 0x11e   : > { %v515_v17 = vsel %vm479_vm10, %v451_v30, %v466_v32 }
 0x11f   : > { %v1306_v13 = vcombine.low %v515_v17, %v515_v17  ;;  %v1308_v1 = vcombine.high %v515_v17, %v515_v17 }
 0x120   : > { %v475_v18 = vpop.permute.xlu0 %474  ;;  %v473_v34 = vpop.permute.xlu1 %472 }
 0x121   : > { %599 = vrot.lane.b32.xlu0 %v1306_v13, %s1425_s28  ;;  %581 = vrot.lane.b32.xlu1 %v1297_v14, %s1425_s28  ;;  %v478_v62 = vsel %vm476_vm0, %v473_v34, %v475_v18  ;;  %v477_v20 = vsel %vm476_vm0, %v471_v23, %v473_v34 }
 0x122   : > { %v1310_v5 = vcombine.low %v478_v62, %v478_v62  ;;  %v1309_v21 = vcombine.low %v471_v23, %v477_v20 }
 0x124   : > { %v576_v47 = vpop.permute.xlu0 %575  ;;  %v574_v50 = vpop.permute.xlu1 %573 }
 0x125   : > { %v610_v49 = vrot.slane %v576_v47, 4  ;;  %591 = vrot.lane.b32.xlu0 %v1302_v39, %s1425_s28  ;;  %585 = vrot.lane.b32.xlu1 %v1299_v41, %s1425_s28  ;;  %v609_v51 = vrot.slane %v574_v50, 4 }
 0x127   : > { %v628_v42 = vsel %vm479_vm10, %v609_v51, %v610_v49 }
 0x128   : > { %v580_v58 = vpop.permute.xlu0 %579  ;;  %v578_v60 = vpop.permute.xlu1 %577  ;;  %v630_v63 = vsel %vm366_vm9, %v574_v50, %v628_v42 }
 0x129   : > { %v612_v59 = vrot.slane %v580_v58, 4  ;;  %595 = vrot.lane.b32.xlu0 %v1304_v56, %s1425_s28  ;;  %589 = vrot.lane.b32.xlu1 %v1301_v57, %s1425_s28  ;;  %v611_v61 = vrot.slane %v578_v60, 4 }
 0x12b   : > { %v631_v43 = vsel %vm479_vm10, %v611_v61, %v612_v59 }
 0x12c   : > { %v632_v54 = vsel %vm366_vm9, %v578_v60, %v631_v43 }
 0x12d   : > { %603 = vrot.lane.b32.xlu0 %v1308_v1, %s1425_s28  ;;  %593 = vrot.lane.b32.xlu1 %v1303_v3, %s1425_s28  ;;  %v1312_v6 = vcombine.high %v630_v63, %v632_v54  ;;  %v1311_v7 = vcombine.low %v630_v63, %v632_v54 }
 0x12f   : > { %736 = vmatprep.subr.bf16.mxu0 %v1312_v6 }
 0x130   : > { %737 = vmatpush1.bf16.msra.mxu0 %v1311_v7 }
 0x131   : > { %607 = vrot.lane.b32.xlu0 %v1310_v5, %s1425_s28  ;;  %601 = vrot.lane.b32.xlu1 %v1307_v8, %s1425_s28 }
 0x135   : > { %839 = vrot.lane.b32.xlu0 %v1492_v16, %s1422_s25  ;;  %605 = vrot.lane.b32.xlu1 %v1309_v21, %s1425_s28 }
 0x139   : > { %864 = vrot.lane.b32.xlu0 %v1531_v40, %s1430_s7  ;;  %678 = vperm.xlu1 %1410, %v675_v22  }
 0x13d   : > { %898 = vrot.lane.b32.xlu0 %v1542_v46, %s1428_s30  ;;  %850 = vrot.lane.b32.xlu1 %v1520_v35, %s1429_s6 }
 0x141   : > { %887 = vrot.lane.b32.xlu1 %v1566_v0, %s1431_s8 }
 0x186   : > { %v584_v10 = vpop.permute.xlu0 %583 }
 0x187   : > { %v614_v30 = vrot.slane %v584_v10, 4 }
 0x18a   : > { %v588_v11 = vpop.permute.xlu0 %587 }
 0x18b   : > { %v616_v40 = vrot.slane %v588_v11, 4 }
 0x18f   : > { %v598_v23 = vpop.permute.xlu1 %597 }
 0x190   : > { %v621_v51 = vrot.slane %v598_v23, 4 }
 0x193   : > { %v600_v24 = vpop.permute.xlu0 %599  ;;  %v582_v25 = vpop.permute.xlu1 %581 }
 0x194   : > { %v613_v29 = vrot.slane %v582_v25, 4  ;;  %v622_v39 = vrot.slane %v600_v24, 4 }
 0x196   : > { %v633_v17 = vsel %vm479_vm10, %v613_v29, %v614_v30  ;;  %v641_v56 = vsel %vm479_vm10, %v621_v51, %v622_v39 }
 0x197   : > { %v592_v12 = vpop.permute.xlu0 %591  ;;  %v586_v32 = vpop.permute.xlu1 %585  ;;  %v634_v35 = vsel %vm366_vm9, %v582_v25, %v633_v17  ;;  %v642_v3 = vsel %vm366_vm9, %v598_v23, %v641_v56  ;;  %v665_v23 = vld [vmem:[%s1806_s1] sm:$0xf] }
 0x198   : > { %v615_v13 = vrot.slane %v586_v32, 4  ;;  %v618_v37 = vrot.slane %v592_v12, 4 }
 0x19a   : > { %v635_v46 = vsel %vm479_vm10, %v615_v13, %v616_v40 }
 0x19b   : > { %v636_v14 = vsel %vm366_vm9, %v586_v32, %v635_v46  ;;  %v596_v0 = vpop.permute.xlu0 %595  ;;  %v590_v18 = vpop.permute.xlu1 %589 }
 0x19c   : > { %v1313_v33 = vcombine.low %v634_v35, %v636_v14  ;;  %v1314_v34 = vcombine.high %v634_v35, %v636_v14  ;;  %v617_v36 = vrot.slane %v590_v18, 4  ;;  %v620_v48 = vrot.slane %v596_v0, 4 }
 0x19e   : > { %738 = vmatprep.subr.bf16.mxu0 %v1314_v34  ;;  %v637_v49 = vsel %vm479_vm10, %v617_v36, %v618_v37 }
 0x19f   : > { %v604_v41 = vpop.permute.xlu0 %603  ;;  %739 = vmatpush1.bf16.msra.mxu0 %v1313_v33  ;;  %v594_v47 = vpop.permute.xlu1 %593  ;;  %v638_v57 = vsel %vm366_vm9, %v590_v18, %v637_v49 }
 0x1a0   : > { %v619_v50 = vrot.slane %v594_v47, 4  ;;  %v624_v59 = vrot.slane %v604_v41, 4 }
 0x1a2   : > { %v639_v55 = vsel %vm479_vm10, %v619_v50, %v620_v48 }
 0x1a3   : > { %v640_v58 = vsel %vm366_vm9, %v594_v47, %v639_v55  ;;  %v602_v42 = vpop.permute.xlu1 %601  ;;  %v608_v63 = vpop.permute.xlu0 %607 }
 0x1a4   : > { %v1315_v60 = vcombine.low %v638_v57, %v640_v58  ;;  %v1316_v61 = vcombine.high %v638_v57, %v640_v58  ;;  %v623_v62 = vrot.slane %v602_v42, 4  ;;  %v626_v5 = vrot.slane %v608_v63, 4 }
 0x1a6   : > { %v643_v1 = vsel %vm479_vm10, %v623_v62, %v624_v59  ;;  %740 = vmatprep.subr.bf16.mxu0 %v1316_v61 }
 0x1a7   : > { %v644_v43 = vsel %vm366_vm9, %v602_v42, %v643_v1  ;;  %741 = vmatpush1.bf16.msra.mxu0 %v1315_v60  ;;  %v606_v54 = vpop.permute.xlu1 %605  ;;  %v840_v42 = vpop.permute.xlu0 %839 }
 0x1a8   : > { %v1317_v6 = vcombine.low %v642_v3, %v644_v43  ;;  %v1318_v7 = vcombine.high %v642_v3, %v644_v43  ;;  %v625_v8 = vrot.slane %v606_v54, 4 }
 0x1aa   : > { %v645_v20 = vsel %vm479_vm10, %v625_v8, %v626_v5  ;;  %742 = vmatprep.subr.bf16.mxu0 %v1318_v7 }
 0x1ab   : > { %v646_v21 = vsel %vm366_vm9, %v606_v54, %v645_v20  ;;  %743 = vmatpush1.bf16.msra.mxu0 %v1317_v6  ;;  %v865_v59 = vpop.permute.xlu0 %864 }
 0x1ac   : > { %v1319_v22 = vcombine.low %v646_v21, %v646_v21  ;;  %v1320_v10 = vcombine.high %v646_v21, %v646_v21 }
 0x1ae   : > { %1321 = vmatprep.subr.msk.bf16.mxu0 %vm479_vm10, %v1320_v10  ;;  %v731_v11 = vsel %vm479_vm10, %v1319_v22, 0 }
 0x1af   : > { %745 = vmatpush1.bf16.msra.mxu0 %v731_v11  ;;  %v899_v61 = vpop.permute.xlu0 %898 }
 0x1b2   : > { %1322 = vmatmul.mubr.msk.bf16.vlgmr.msra.gmra.mrb[0].mxu0 %vm726_vm1, %v665_v23 }
 0x1b8   : > { %v679_v24 = vpop.permute.xlu1 %678 }
 0x285   : > { %v770_v25 = vpop.f32.mrb[0].mxu0 }
 0x286   : > { %v771_v29 = vadd.f32 %v770_v25, %v679_v24  ;;  %v772_v30 = vpop.f32.mrb[1].mxu0 }
 0x287   : > { %v773_v12 = vadd.f32 %v772_v30, %v679_v24  ;;  %v774_v32 = vpop.f32.mrb[2].mxu0 }
 0x288   : > { %v777_v40 = vmax.f32 %v771_v29, 0.0  ;;  %v775_v17 = vpop.f32.mrb[3].mxu0 }
 0x289   : > { %v778_v13 = vmax.f32 %v773_v12, 0.0 }
 0x28a   : > { %v795_v46 = vpack.c.bf16 %v777_v40, %v777_v40  ;;  %v798_v14 = vmul.f32 %v777_v40, %v1534_v44  ;;  %v818_v33 = vmul.f32 %v1512_v26, %v777_v40  ;;  %v804_v41 = vmul.f32 %v777_v40, %v1557_v53 }
 0x28b   : > { %v796_v35 = vpack.c.bf16 %v778_v13, %v778_v13  ;;  %v799_v34 = vmul.f32 %v1516_v28, %v778_v13  ;;  %v805_v37 = vmul.f32 %v1529_v38, %v778_v13  ;;  %v819_v39 = vmul.f32 %v778_v13, %v1539_v45 }
 0x28c   : > { %872 = vrot.lane.b32.xlu1 %v795_v46, %s1426_s29  ;;  %v837_v0 = vrot.slane %v795_v46, 4  ;;  %v801_v18 = vpack.c.bf16 %v798_v14, %v798_v14  ;;  %v821_v36 = vpack.c.bf16 %v818_v33, %v818_v33  ;;  %v813_v48 = vmul.f32 %v778_v13, %v1551_v52 }
 0x28d   : > { %874 = vrot.lane.b32.xlu0 %v796_v35, %s1426_s29  ;;  %v802_v44 = vpack.c.bf16 %v799_v34, %v799_v34  ;;  %v838_v47 = vrot.slane %v796_v35, 4  ;;  %v808_v26 = vpack.c.bf16 %v805_v37, %v805_v37  ;;  %v822_v28 = vpack.c.bf16 %v819_v39, %v819_v39 }
 0x28e   : > { %v807_v49 = vpack.c.bf16 %v804_v41, %v804_v41  ;;  %v812_v38 = vmul.f32 %v1514_v27, %v777_v40  ;;  %v816_v51 = vpack.c.bf16 %v813_v48, %v813_v48  ;;  %v827_v56 = vmul.f32 %v1571_v4, %v777_v40  ;;  %v851_v4 = vpop.permute.xlu1 %850 }
 0x28f   : > { %v863_v50 = vrot.slane %v808_v26, 4  ;;  %v828_v27 = vmul.f32 %v778_v13, %v1587_v15  ;;  %v789_v54 = vmul.f32 %v777_v40, %v1577_v9 }
 0x290   : > { %841 = vrot.lane.b32.xlu1 %v837_v0, %s1422_s25  ;;  %v862_v45 = vrot.slane %v807_v49, 4  ;;  %v815_v53 = vpack.c.bf16 %v812_v38, %v812_v38  ;;  %v881_v55 = vrot.slane %v816_v51, 4  ;;  %v830_v57 = vpack.c.bf16 %v827_v56, %v827_v56 }
 0x291   : > { %852 = vrot.lane.b32.xlu0 %v801_v18, %s1429_s6  ;;  %v831_v58 = vpack.c.bf16 %v828_v27, %v828_v27  ;;  %v792_v8 = vpack.c.bf16 %v789_v54, %v789_v54 }
 0x292   : > { %v880_v52 = vrot.slane %v815_v53, 4  ;;  %v888_v60 = vpop.permute.xlu1 %887 }
 0x294   : > { %908 = vrot.lane.b32.xlu1 %v837_v0, %s1432_s9 }
 0x295   : > { %894 = vrot.lane.b32.xlu0 %v821_v36, %s1428_s30 }
 0x298   : > { %854 = vrot.lane.b32.xlu1 %v802_v44, %s1429_s6 }
 0x299   : > { %843 = vrot.lane.b32.xlu0 %v838_v47, %s1422_s25 }
 0x29c   : > { %896 = vrot.lane.b32.xlu1 %v822_v28, %s1428_s30 }
 0x29d   : > { %868 = vrot.lane.b32.xlu0 %v863_v50, %s1430_s7 }
 0x2a0   : > { %866 = vrot.lane.b32.xlu1 %v862_v45, %s1430_s7 }
 0x2a1   : > { %885 = vrot.lane.b32.xlu0 %v881_v55, %s1431_s8 }
 0x2a4   : > { %883 = vrot.lane.b32.xlu1 %v880_v52, %s1431_s8 }
 0x2a5   : > { %910 = vrot.lane.b32.xlu0 %v838_v47, %s1432_s9 }
 0x2a8   : > { %912 = vrot.lane.b32.xlu1 %v1492_v16, %s1432_s9  ;;  %v790_v16 = vmul.f32 %v1568_v2, %v778_v13 }
 0x2a9   : > { %919 = vrot.lane.b32.xlu0 %v830_v57, %s1433_s10 }
 0x2aa   : > { %v793_v7 = vpack.c.bf16 %v790_v16, %v790_v16 }
 0x2ac   : > { %921 = vrot.lane.b32.xlu1 %v831_v58, %s1433_s10 }
 0x2ad   : > { %923 = vrot.lane.b32.xlu0 %v1604_v19, %s1433_s10 }
 0x2fe   : > { %v873_v62 = vpop.permute.xlu1 %872 }
 0x2ff   : > { %v875_v63 = vpop.permute.xlu0 %874 }
 0x300   : > { %v876_v49 = vsel %vm280_vm8, %v873_v62, %v875_v63 }
 0x302   : > { %v842_v15 = vpop.permute.xlu1 %841 }
 0x303   : > { %v853_v1 = vpop.permute.xlu0 %852  ;;  %v845_v5 = vsel %vm315_vm7, %v840_v42, %v842_v15 }
 0x304   : > { %v929_v22 = vsel %vm479_vm10, %v1599_v31, %v845_v5  ;;  %v856_v14 = vsel %vm401_vm14, %v851_v4, %v853_v1 }
 0x306   : > { %v909_v3 = vpop.permute.xlu1 %908 }
 0x307   : > { %v895_v43 = vpop.permute.xlu0 %894 }
 0x308   : > { %v956_v46 = vsel %vm479_vm10, %v895_v43, %v909_v3 }
 0x30a   : > { %v855_v6 = vpop.permute.xlu1 %854 }
 0x30b   : > { %v844_v19 = vpop.permute.xlu0 %843  ;;  %v857_v0 = vsel %vm401_vm14, %v853_v1, %v855_v6  ;;  %v1120_v1 = vld [vmem:[%s1809_s4] sm:$0xff] }
 0x30c   : > { %v846_v20 = vsel %vm315_vm7, %v842_v15, %v844_v19  ;;  %v935_v21 = vsel %vm479_vm10, %v793_v7, %v844_v19 }
 0x30d   : > { %v932_v10 = vsel %vm479_vm10, %v792_v8, %v846_v20  ;;  %v1324_v11 = vcombine.low %v935_v21, %v935_v21  ;;  %v1326_v24 = vcombine.high %v935_v21, %v935_v21 }
 0x30e   : > { %v897_v2 = vpop.permute.xlu1 %896  ;;  %v1323_v23 = vcombine.low %v929_v22, %v932_v10  ;;  %v1325_v29 = vcombine.high %v929_v22, %v932_v10 }
 0x30f   : > { %1022 = vrot.lane.b32.xlu0 %v1324_v11, %s1425_s28  ;;  %v869_v9 = vpop.permute.xlu0 %868  ;;  %v900_v32 = vsel %vm449_vm11, %v895_v43, %v897_v2  ;;  %v901_v34 = vsel %vm449_vm11, %v897_v2, %v899_v61 }
 0x310   : > { %1020 = vrot.lane.b32.xlu1 %v1323_v23, %s1425_s28  ;;  %v944_v47 = vsel %vm479_vm10, %v855_v6, %v869_v9 }
 0x311   : > { %v1328_v28 = vcombine.low %v944_v47, %v944_v47  ;;  %v1330_v53 = vcombine.high %v944_v47, %v944_v47 }
 0x312   : > { %v867_v25 = vpop.permute.xlu1 %866 }
 0x313   : > { %1026 = vrot.lane.b32.xlu0 %v1326_v24, %s1425_s28  ;;  %v886_v30 = vpop.permute.xlu0 %885  ;;  %v870_v40 = vsel %vm416_vm12, %v865_v59, %v867_v25  ;;  %v871_v17 = vsel %vm416_vm12, %v867_v25, %v869_v9 }
 0x314   : > { %1024 = vrot.lane.b32.xlu1 %v1325_v29, %s1425_s28  ;;  %v938_v36 = vsel %vm479_vm10, %v856_v14, %v870_v40  ;;  %v941_v37 = vsel %vm479_vm10, %v857_v0, %v871_v17  ;;  %v890_v50 = vsel %vm437_vm15, %v886_v30, %v888_v60 }
 0x315   : > { %v1327_v26 = vcombine.low %v938_v36, %v941_v37  ;;  %v1329_v38 = vcombine.high %v938_v36, %v941_v37  ;;  %v953_v55 = vsel %vm479_vm10, %v875_v63, %v890_v50 }
 0x316   : > { %v884_v12 = vpop.permute.xlu1 %883  ;;  %v1332_v27 = vcombine.low %v953_v55, %v953_v55  ;;  %v1334_v42 = vcombine.high %v953_v55, %v953_v55 }
 0x317   : > { %v911_v31 = vpop.permute.xlu0 %910  ;;  %v889_v48 = vsel %vm437_vm15, %v884_v12, %v886_v30  ;;  %v947_v51 = vsel %vm479_vm10, %v873_v62, %v884_v12 }
 0x318   : > { %v914_v13 = vsel %vm464_vm13, %v909_v3, %v911_v31  ;;  %v950_v45 = vsel %vm479_vm10, %v876_v49, %v889_v48 }
 0x319   : > { %v959_v35 = vsel %vm479_vm10, %v900_v32, %v914_v13  ;;  %v1331_v52 = vcombine.low %v947_v51, %v950_v45  ;;  %v1333_v57 = vcombine.high %v947_v51, %v950_v45 }
 0x31a   : > { %v913_v18 = vpop.permute.xlu1 %912  ;;  %v1335_v33 = vcombine.low %v956_v46, %v959_v35  ;;  %v1337_v4 = vcombine.high %v956_v46, %v959_v35 }
 0x31b   : > { %v915_v44 = vsel %vm464_vm13, %v911_v31, %v913_v18  ;;  %v920_v56 = vpop.permute.xlu0 %919 }
 0x31c   : > { %v962_v39 = vsel %vm479_vm10, %v901_v34, %v915_v44  ;;  %1044 = vrot.lane.b32.xlu1 %v1335_v33, %s1425_s28 }
 0x31d   : > { %v1336_v41 = vcombine.low %v962_v39, %v962_v39  ;;  %v1338_v61 = vcombine.high %v962_v39, %v962_v39 }
 0x31e   : > { %v922_v58 = vpop.permute.xlu1 %921 }
 0x31f   : > { %1046 = vrot.lane.b32.xlu0 %v1336_v41, %s1425_s28  ;;  %v925_v59 = vsel %vm476_vm0, %v920_v56, %v922_v58  ;;  %v924_v60 = vpop.permute.xlu0 %923 }
 0x320   : > { %1028 = vrot.lane.b32.xlu1 %v1327_v26, %s1425_s28  ;;  %v1339_v62 = vcombine.low %v920_v56, %v925_v59  ;;  %v926_v63 = vsel %vm476_vm0, %v922_v58, %v924_v60 }
 0x321   : > { %v1340_v15 = vcombine.low %v926_v63, %v926_v63 }
 0x323   : > { %1030 = vrot.lane.b32.xlu0 %v1328_v28, %s1425_s28 }
 0x324   : > { %1032 = vrot.lane.b32.xlu1 %v1329_v38, %s1425_s28 }
 0x327   : > { %1034 = vrot.lane.b32.xlu0 %v1330_v53, %s1425_s28 }
 0x328   : > { %1036 = vrot.lane.b32.xlu1 %v1331_v52, %s1425_s28 }
 0x32b   : > { %1038 = vrot.lane.b32.xlu0 %v1332_v27, %s1425_s28 }
 0x32c   : > { %1040 = vrot.lane.b32.xlu1 %v1333_v57, %s1425_s28 }
 0x32f   : > { %1042 = vrot.lane.b32.xlu0 %v1334_v42, %s1425_s28 }
 0x330   : > { %1048 = vrot.lane.b32.xlu1 %v1337_v4, %s1425_s28 }
 0x333   : > { %1050 = vrot.lane.b32.xlu0 %v1338_v61, %s1425_s28 }
 0x334   : > { %1052 = vrot.lane.b32.xlu1 %v1339_v62, %s1425_s28 }
 0x337   : > { %1054 = vrot.lane.b32.xlu0 %v1340_v15, %s1425_s28 }
 0x338   : > { %1123 = vperm.xlu1 %1410, %v1120_v1  }
 0x381   : > { %v1023_v3 = vpop.permute.xlu0 %1022 }
 0x382   : > { %v1021_v16 = vpop.permute.xlu1 %1020  ;;  %v1057_v43 = vrot.slane %v1023_v3, 4 }
 0x383   : > { %v1056_v54 = vrot.slane %v1021_v16, 4 }
 0x385   : > { %v1027_v5 = vpop.permute.xlu0 %1026  ;;  %v1074_v8 = vsel %vm479_vm10, %v1056_v54, %v1057_v43 }
 0x386   : > { %v1059_v6 = vrot.slane %v1027_v5, 4  ;;  %v1025_v7 = vpop.permute.xlu1 %1024  ;;  %v1075_v21 = vsel %vm366_vm9, %v1021_v16, %v1074_v8  ;;  %v1110_v16 = vld [vmem:[%s1808_s3] sm:$0xf] }
 0x387   : > { %v1058_v19 = vrot.slane %v1025_v7, 4 }
 0x389   : > { %v1076_v20 = vsel %vm479_vm10, %v1058_v19, %v1059_v6 }
 0x38a   : > { %v1077_v22 = vsel %vm366_vm9, %v1025_v7, %v1076_v20 }
 0x38b   : > { %v1342_v10 = vcombine.high %v1075_v21, %v1077_v22  ;;  %v1341_v11 = vcombine.low %v1075_v21, %v1077_v22 }
 0x38d   : > { %1180 = vmatprep.subr.bf16.mxu1 %v1342_v10 }
 0x38e   : > { %1181 = vmatpush1.bf16.msra.mxu1 %v1341_v11  ;;  %v1045_v2 = vpop.permute.xlu1 %1044 }
 0x38f   : > { %v1068_v48 = vrot.slane %v1045_v2, 4 }
 0x391   : > { %v1047_v23 = vpop.permute.xlu0 %1046 }
 0x392   : > { %v1029_v9 = vpop.permute.xlu1 %1028  ;;  %v1069_v37 = vrot.slane %v1047_v23, 4 }
 0x393   : > { %v1060_v30 = vrot.slane %v1029_v9, 4 }
 0x394   : > { %v1086_v49 = vsel %vm479_vm10, %v1068_v48, %v1069_v37 }
 0x395   : > { %v1031_v24 = vpop.permute.xlu0 %1030  ;;  %v1087_v58 = vsel %vm366_vm9, %v1045_v2, %v1086_v49 }
 0x396   : > { %v1061_v25 = vrot.slane %v1031_v24, 4  ;;  %v1033_v29 = vpop.permute.xlu1 %1032 }
 0x397   : > { %v1062_v32 = vrot.slane %v1033_v29, 4 }
 0x398   : > { %v1078_v31 = vsel %vm479_vm10, %v1060_v30, %v1061_v25 }
 0x399   : > { %v1035_v12 = vpop.permute.xlu0 %1034  ;;  %v1079_v35 = vsel %vm366_vm9, %v1029_v9, %v1078_v31 }
 0x39a   : > { %v1063_v40 = vrot.slane %v1035_v12, 4  ;;  %v1037_v17 = vpop.permute.xlu1 %1036 }
 0x39b   : > { %v1064_v36 = vrot.slane %v1037_v17, 4 }
 0x39c   : > { %v1080_v13 = vsel %vm479_vm10, %v1062_v32, %v1063_v40 }
 0x39d   : > { %v1039_v46 = vpop.permute.xlu0 %1038  ;;  %v1081_v14 = vsel %vm366_vm9, %v1033_v29, %v1080_v13 }
 0x39e   : > { %v1065_v0 = vrot.slane %v1039_v46, 4  ;;  %v1041_v18 = vpop.permute.xlu1 %1040  ;;  %v1344_v33 = vcombine.high %v1079_v35, %v1081_v14  ;;  %v1343_v34 = vcombine.low %v1079_v35, %v1081_v14 }
 0x39f   : > { %v1066_v41 = vrot.slane %v1041_v18, 4 }
 0x3a0   : > { %1182 = vmatprep.subr.bf16.mxu1 %v1344_v33  ;;  %v1082_v39 = vsel %vm479_vm10, %v1064_v36, %v1065_v0 }
 0x3a1   : > { %v1043_v44 = vpop.permute.xlu0 %1042  ;;  %1183 = vmatpush1.bf16.msra.mxu1 %v1343_v34  ;;  %v1083_v50 = vsel %vm366_vm9, %v1037_v17, %v1082_v39 }
 0x3a2   : > { %v1067_v47 = vrot.slane %v1043_v44, 4  ;;  %v1049_v26 = vpop.permute.xlu1 %1048 }
 0x3a3   : > { %v1070_v45 = vrot.slane %v1049_v26, 4 }
 0x3a4   : > { %v1084_v28 = vsel %vm479_vm10, %v1066_v41, %v1067_v47 }
 0x3a5   : > { %v1051_v38 = vpop.permute.xlu0 %1050  ;;  %v1085_v51 = vsel %vm366_vm9, %v1041_v18, %v1084_v28 }
 0x3a6   : > { %v1071_v53 = vrot.slane %v1051_v38, 4  ;;  %v1346_v55 = vcombine.high %v1083_v50, %v1085_v51  ;;  %v1345_v52 = vcombine.low %v1083_v50, %v1085_v51  ;;  %v1053_v56 = vpop.permute.xlu1 %1052 }
 0x3a7   : > { %v1072_v4 = vrot.slane %v1053_v56, 4 }
 0x3a8   : > { %v1088_v27 = vsel %vm479_vm10, %v1070_v45, %v1071_v53  ;;  %1184 = vmatprep.subr.bf16.mxu1 %v1346_v55 }
 0x3a9   : > { %v1055_v57 = vpop.permute.xlu0 %1054  ;;  %1185 = vmatpush1.bf16.msra.mxu1 %v1345_v52  ;;  %v1089_v42 = vsel %vm366_vm9, %v1049_v26, %v1088_v27 }
 0x3aa   : > { %v1073_v59 = vrot.slane %v1055_v57, 4  ;;  %v1348_v60 = vcombine.high %v1087_v58, %v1089_v42  ;;  %v1347_v61 = vcombine.low %v1087_v58, %v1089_v42 }
 0x3ac   : > { %v1090_v62 = vsel %vm479_vm10, %v1072_v4, %v1073_v59  ;;  %1186 = vmatprep.subr.bf16.mxu1 %v1348_v60 }
 0x3ad   : > { %v1091_v63 = vsel %vm366_vm9, %v1053_v56, %v1090_v62  ;;  %1187 = vmatpush1.bf16.msra.mxu1 %v1347_v61 }
 0x3ae   : > { %v1350_v15 = vcombine.high %v1091_v63, %v1091_v63  ;;  %v1349_v1 = vcombine.low %v1091_v63, %v1091_v63 }
 0x3b0   : > { %1351 = vmatprep.subr.msk.bf16.mxu1 %vm479_vm10, %v1350_v15  ;;  %v1175_v3 = vsel %vm479_vm10, %v1349_v1, 0 }
 0x3b1   : > { %1189 = vmatpush1.bf16.msra.mxu1 %v1175_v3 }
 0x3b4   : > { %1352 = vmatmul.mubr.msk.bf16.vlgmr.msra.gmra.mrb[0].mxu1 %vm726_vm1, %v1110_v16 }
 0x3b7   : > { %v1124_v43 = vpop.permute.xlu1 %1123 }
 0x487   : > { %v1214_v54 = vpop.f32.mrb[0].mxu1 }
 0x488   : > { %v1215_v5 = vadd.f32 %v1214_v54, %v1124_v43  ;;  %v1216_v6 = vpop.f32.mrb[1].mxu1 }
 0x489   : > { %v1217_v7 = vadd.f32 %v1216_v6, %v1124_v43  ;;  %v1218_v19 = vpop.f32.mrb[2].mxu1 }
 0x48a   : > { %v1221_v8 = vmax.f32 %v1215_v5, 0.0  ;;  %v1219_v20 = vpop.f32.mrb[3].mxu1 }
 0x48b   : > { %v1222_v21 = vmax.f32 %v1217_v7, 0.0 }
 0x48c   : > { %1223 = vst [vmem:[%s224_s24] sm:$0xff] %v1221_v8 }
 0x48d   : > { %1224 = vst [vmem:[%s224_s24 + $0x8] sm:$0xff] %v1222_v21 }
 0x48e PF: > { %s15_s18 = sadd.s32 1, %s1418_s18  }
 0x48f   : > { %p12_p4 = scmp.ge.s32.totalorder %s15_s18, 4  }
 0x491   :  { %14 = sbr.rel (!%p12_p4) target bundleno = 1 (0x1), region = 70 }

</bundles_post_ra>
